<compile_context>
chip_gen: v7x
topology: tpu7x:2x2x1
jax: 0.10.0
libtpu: 0.0.40
codegen_flags: <defaults>
</compile_context>

<pallas_src>
import functools

import jax
import jax.numpy as jnp
from jax.experimental import pallas as pl
from jax.experimental.pallas import tpu as pltpu


# ----------------------------------------------------------------------------
# Wavelet mother functions.
# TODO(synk): Laplace()/Mexh()/Morlet() bodies are not included in the provided
# spec; the standard WaveletKernelNet forms are used here.
def _laplace(p):
    A, ep, tal, f = 0.08, 0.03, 0.1, 50.0
    w = 2.0 * jnp.pi * f
    q = 1.0 - ep * ep
    return A * jnp.exp((-ep / jnp.sqrt(q)) * (w * (p - tal))) * (-jnp.sin(w * (p - tal)))


def _mexh(p):
    return (1.0 - jnp.square(p)) * jnp.exp(-jnp.square(p) / 2.0)


def _morlet(p):
    return jnp.exp(-jnp.square(p) / 2.0) * jnp.cos(5.0 * p)


_WAVE_FUNCS = {"L": _laplace, "M": _mexh, "m": _morlet}


def dfw_unit_init(wave_choose, out_channels, kernel_size):
    """Mirrors dfw_unit.__init__ (init values of a_ / time_step, effective K)."""
    K = kernel_size - 1
    if kernel_size % 2 == 0:
        K += 1
    if wave_choose == "L":
        time_step = jnp.linspace(0.0, 1.0, K, dtype=jnp.float32)
        a_ = jnp.linspace(0.1, 2.0, out_channels, dtype=jnp.float32)
    elif wave_choose in ("M", "m"):
        left = jnp.linspace(-(K / 2) + 1.0, -1.0, K // 2, dtype=jnp.float32)
        right = jnp.linspace(0.0, K / 2 - 1.0, K // 2, dtype=jnp.float32)
        time_step = jnp.concatenate([left, right])
        hi = 3.0 if wave_choose == "M" else 4.5
        a_ = jnp.linspace(0.1, hi, out_channels, dtype=jnp.float32)
    else:
        raise ValueError("wave_choose must be one of 'L', 'M', 'm'")
    return a_, time_step, K


# ----------------------------------------------------------------------------
# Pallas conv1d (single input channel, stride=1, dilation=1, no bias).

def _round_up(x, m):
    return (x + m - 1) // m * m


def _dfw_conv1d_kernel(x_ref, w_ref, o_ref, *, K_pad, TILE_T):
    """One (batch n, channel-tile c, time-tile t) grid step.

    x_ref: (1, 1, 1, TILE_T + K_pad - 1)  halo'd input window for (n, t)
    w_ref: (TILE_C, K_pad)                filter-bank tile (taps >= K are zero)
    o_ref: (1, TILE_C, TILE_T)            lane-dense output tile (time on lanes)
    """
    # im2col: K_pad statically-shifted copies of the halo'd window stacked on
    # the sublane axis.  Built once per tile (cheap static lane relayouts on
    # the load/XLU path, overlapped by the pipeline) — no per-tap full-tile
    # broadcasts and no per-tap unaligned *dynamic* slices.
    x = x_ref[...][0, 0]                                        # (1, TILE_T+K_pad-1)
    x_win = jnp.concatenate(
        [x[:, k:k + TILE_T] for k in range(K_pad)], axis=0)     # (K_pad, TILE_T)
    # One MXU matmul does the whole MAC for this tile; f32 accumulation.
    acc = jnp.dot(w_ref[...], x_win, preferred_element_type=jnp.float32)
    o_ref[...] = acc[None].astype(o_ref.dtype)                  # (1, TILE_C, TILE_T)


def conv1d_no_bias(waveforms, w_eff, padding=1):
    """== F.conv1d(waveforms, w_eff[:, None, :], stride=1, padding=padding)."""
    N, C_in, L = waveforms.shape
    assert C_in == 1, "dfw_unit only supports one input channel"
    Ce, K = w_eff.shape
    T = L + 2 * padding - K + 1
    dtype = waveforms.dtype

    LANE, SUB = 128, 8
    # Lane-dense output tiles: time on the 128-lane axis, 512 lanes per step
    # when the signal is long enough (HBM-roofline sweet spot), one padded tile
    # otherwise.  Channel tiles are sublane-aligned; taps padded to a sublane
    # group (zero taps contribute exactly 0).
    TILE_T = 512 if T >= 512 else _round_up(T, LANE)
    T_pad = _round_up(T, TILE_T)
    TILE_C = 128 if Ce >= 128 else _round_up(Ce, SUB)
    Ce_pad = _round_up(Ce, TILE_C)
    K_pad = _round_up(K, SUB)
    n_t = T_pad // TILE_T
    n_c = Ce_pad // TILE_C
    W = TILE_T + K_pad - 1                       # input window incl. halo

    w_pad = jnp.zeros((Ce_pad, K_pad), w_eff.dtype).at[:Ce, :K].set(w_eff)

    # Conv zero-padding + alignment padding, then pre-gather the overlapping
    # (halo'd) per-tile windows so every Pallas block is a plain Blocked block.
    # The input is Ce x smaller than the output, so this extra input pass is
    # negligible; for very long signals it could be replaced by pl.Element
    # offsets / manual make_async_copy to avoid materializing the windows.
    x_len = T_pad + K_pad - 1
    x_row = jnp.pad(waveforms[:, 0, :],
                    ((0, 0), (padding, x_len - L - padding)))        # (N, x_len)
    win_idx = jnp.arange(n_t)[:, None] * TILE_T + jnp.arange(W)[None, :]
    x_tiles = jnp.take(x_row, win_idx, axis=1)[:, :, None, :]        # (N, n_t, 1, W)

    out = pl.pallas_call(
        functools.partial(_dfw_conv1d_kernel, K_pad=K_pad, TILE_T=TILE_T),
        out_shape=jax.ShapeDtypeStruct((N, Ce_pad, T_pad), dtype),
        grid=(N, n_c, n_t),
        in_specs=[
            pl.BlockSpec((1, 1, 1, W), lambda n, c, t: (n, t, 0, 0)),
            pl.BlockSpec((TILE_C, K_pad), lambda n, c, t: (c, 0)),
        ],
        out_specs=pl.BlockSpec((1, TILE_C, TILE_T), lambda n, c, t: (n, c, t)),
        compiler_params=pltpu.CompilerParams(
            dimension_semantics=("parallel", "parallel", "arbitrary"),
            vmem_limit_bytes=32 * 1024 * 1024,
        ),
    )(x_tiles, w_pad)
    return out[:, :Ce, :T]


# ----------------------------------------------------------------------------
# Module forward.

def dfw_unit_forward(waveforms, a_, time_step, layeri_softmaxP, wave_choose,
                     fused_use, padding=1):
    """dfw_unit.forward."""
    # Filter-bank generation + optional fusion: (out_channels x K) glue.
    p1 = time_step[None, :] / a_[:, None]                   # (out_channels, K)
    filters = _WAVE_FUNCS[wave_choose](p1)                  # (out_channels, K)
    if fused_use:
        w_eff = jnp.dot(layeri_softmaxP, filters)           # (real_cout, K)
    else:
        w_eff = filters
    return conv1d_no_bias(waveforms, w_eff, padding=padding)


if __name__ == "__main__":
    key = jax.random.PRNGKey(0)
    kx, kp = jax.random.split(key)

    # Small shapes consistent with the module: batch=2, in_channels=1, L=16,
    # out_channels=8, real_cout=4, ctor kernel_size=4 (-> effective K=4).
    N, L = 2, 16
    out_channels, real_cout, kernel_size = 8, 4, 4

    waveforms = jax.random.normal(kx, (N, 1, L), jnp.float32)
    # Non-trivial fusion matrix (the module registers zeros; pruning code fills
    # it with a row-softmax, which is what we exercise here).
    layeri_softmaxP = jax.nn.softmax(
        jax.random.normal(kp, (real_cout, out_channels), jnp.float32), axis=-1)

    def ref_conv(wave, w_eff, padding=1):   # exact f32 element-wise reference
        n, _, l = wave.shape
        ce, k = w_eff.shape
        xp = jnp.pad(wave[:, 0, :], ((0, 0), (padding, padding)))
        t = l + 2 * padding - k + 1
        ref = jnp.zeros((n, ce, t), jnp.float32)
        for kk in range(k):
            ref = ref + w_eff[None, :, kk:kk + 1] * xp[:, None, kk:kk + t]
        return ref

    for wave_choose in ("M", "L", "m"):
        a_, time_step, K = dfw_unit_init(wave_choose, out_channels, kernel_size)
        p1 = time_step[None, :] / a_[:, None]
        filters = _WAVE_FUNCS[wave_choose](p1)
        for fused in (False, True):
            out = dfw_unit_forward(waveforms, a_, time_step, layeri_softmaxP,
                                   wave_choose, fused_use=fused)
            out = jax.block_until_ready(out)
            w_eff = jnp.dot(layeri_softmaxP, filters) if fused else filters
            ref = ref_conv(waveforms, w_eff)
            assert out.shape == ref.shape, (out.shape, ref.shape)
            assert jnp.allclose(out, ref, atol=1e-4, rtol=1e-4), (
                wave_choose, fused, float(jnp.max(jnp.abs(out - ref))))

    print("KERNEL_OK")
</pallas_src>

<mosaic_0001>
module attributes {stable_mosaic.version = 11 : i64} {
  func.func @_dfw_conv1d_kernel(%arg0: i32, %arg1: i32, %arg2: i32, %arg3: memref<1x1x1x135xf32, #tpu.memory_space<vmem>>, %arg4: memref<8x8xf32, #tpu.memory_space<vmem>>, %arg5: memref<1x8x128xf32, #tpu.memory_space<vmem>>) attributes {dimension_semantics = [#tpu.dimension_semantics<parallel>, #tpu.dimension_semantics<parallel>, #tpu.dimension_semantics<arbitrary>], iteration_bounds = array<i64: 2, 1, 1>, scalar_prefetch = 0 : i64, scratch_operands = 0 : i64, tpu.core_type = #tpu.core_type<tc>, window_params = [{transform_indices = @transform_0, window_bounds = array<i64: 1, 1, 1, 135>}, {transform_indices = @transform_1, window_bounds = array<i64: 8, 8>}, {transform_indices = @transform_2, window_bounds = array<i64: 1, 8, 128>}]} {
    %c0 = arith.constant 0 : index
    %c0_0 = arith.constant 0 : index
    %c0_1 = arith.constant 0 : index
    %c0_2 = arith.constant 0 : index
    %0 = vector.load %arg3[%c0, %c0_0, %c0_1, %c0_2] : memref<1x1x1x135xf32, #tpu.memory_space<vmem>>, vector<1x1x1x135xf32>
    %1 = vector.shape_cast %0 : vector<1x1x1x135xf32> to vector<1x135xf32>
    %2 = vector.extract_strided_slice %1 {offsets = [0, 0], sizes = [1, 128], strides = [1, 1]} : vector<1x135xf32> to vector<1x128xf32>
    %3 = vector.extract_strided_slice %1 {offsets = [0, 1], sizes = [1, 128], strides = [1, 1]} : vector<1x135xf32> to vector<1x128xf32>
    %4 = vector.extract_strided_slice %1 {offsets = [0, 2], sizes = [1, 128], strides = [1, 1]} : vector<1x135xf32> to vector<1x128xf32>
    %5 = vector.extract_strided_slice %1 {offsets = [0, 3], sizes = [1, 128], strides = [1, 1]} : vector<1x135xf32> to vector<1x128xf32>
    %6 = vector.extract_strided_slice %1 {offsets = [0, 4], sizes = [1, 128], strides = [1, 1]} : vector<1x135xf32> to vector<1x128xf32>
    %7 = vector.extract_strided_slice %1 {offsets = [0, 5], sizes = [1, 128], strides = [1, 1]} : vector<1x135xf32> to vector<1x128xf32>
    %8 = vector.extract_strided_slice %1 {offsets = [0, 6], sizes = [1, 128], strides = [1, 1]} : vector<1x135xf32> to vector<1x128xf32>
    %9 = vector.extract_strided_slice %1 {offsets = [0, 7], sizes = [1, 128], strides = [1, 1]} : vector<1x135xf32> to vector<1x128xf32>
    %10 = tpu.concatenate %2, %3, %4, %5, %6, %7, %8, %9 in 0 : vector<1x128xf32>, vector<1x128xf32>, vector<1x128xf32>, vector<1x128xf32>, vector<1x128xf32>, vector<1x128xf32>, vector<1x128xf32>, vector<1x128xf32> -> vector<8x128xf32>
    %c0_3 = arith.constant 0 : index
    %c0_4 = arith.constant 0 : index
    %11 = vector.load %arg4[%c0_3, %c0_4] : memref<8x8xf32, #tpu.memory_space<vmem>>, vector<8x8xf32>
    %cst = arith.constant dense<0.000000e+00> : vector<8x128xf32>
    %12 = tpu.matmul %11, %10, %cst {dimension_numbers = #tpu.dot_dimension_numbers<[1], [0], [0], [1], [0, 0, 1, 1], [], []>} : vector<8x8xf32>, vector<8x128xf32>, vector<8x128xf32> -> vector<8x128xf32>
    %13 = vector.shape_cast %12 : vector<8x128xf32> to vector<1x8x128xf32>
    %c0_5 = arith.constant 0 : index
    %c0_6 = arith.constant 0 : index
    %c0_7 = arith.constant 0 : index
    %14 = vector.load %arg5[%c0_5, %c0_6, %c0_7] : memref<1x8x128xf32, #tpu.memory_space<vmem>>, vector<1x8x128xf32>
    tpu.vector_store %arg5[%c0_5, %c0_6, %c0_7], %13 {strides = array<i32>} : memref<1x8x128xf32, #tpu.memory_space<vmem>>, vector<1x8x128xf32>,
    return
  }
  func.func @transform_0(%arg0: i32, %arg1: i32, %arg2: i32) -> (i32, i32, i32, i32) {
    %c0_i32 = arith.constant 0 : i32
    %c0_i32_0 = arith.constant 0 : i32
    %c0_i32_1 = arith.constant 0 : i32
    return %arg0, %arg2, %c0_i32, %c0_i32_0 : i32, i32, i32, i32
  }
  func.func @transform_1(%arg0: i32, %arg1: i32, %arg2: i32) -> (i32, i32) {
    %c0_i32 = arith.constant 0 : i32
    %c0_i32_0 = arith.constant 0 : i32
    return %arg1, %c0_i32 : i32, i32
  }
  func.func @transform_2(%arg0: i32, %arg1: i32, %arg2: i32) -> (i32, i32, i32) {
    %c0_i32 = arith.constant 0 : i32
    return %arg0, %arg1, %arg2 : i32, i32, i32
  }
}

</mosaic_0001>

<bundles_post_ra>
// kernel: tpu_custom_call.1
= control target key start
LH: loop header
LB: loop body
LE: loop exit
PB: predicated region body
PF: predicated region fallthrough
CT: control target
= control target key end

     0   :  { %7 = vsyncpa [#allocation3], 0  ;;  %s967_s0 = inlined_call_operand.hbm [shape: f32[2,1,1,135], index: 0, kind: input, shape index: {}]   ;;  %s968_s1 = inlined_call_operand.hbm [shape: f32[8,8], index: 1, kind: input, shape index: {}]   ;;  %s969_s2 = inlined_call_operand.hbm [shape: f32[2,8,128], index: 2, kind: output, shape index: {}]  }
   0x1   :  { %9 = vsyncpa [#allocation3 + $0x1], 0 }
   0x2   :  { %10 = vsyncpa [#allocation6], 0 }
   0x3   :  { %11 = vsyncpa [#allocation4], 0 }
   0x4   :  { %13 = vsyncpa [#allocation4 + $0x1], 0  ;;  %s750_s9 = smov 0   ;;  %s752_s10 = smov 0  }
   0x5   :  { %s754_s11 = smov 0   ;;  %s756_s12 = smov 0  }
   0x6   :  { %s758_s13 = smov 0   ;;  %s760_s14 = smov 0  }
   0x7 LB: > { %s470_s15 = sadd.s32 4294967295, %s721_s14   ;;  %s471_s16 = sadd.s32 4294967294, %s721_s14   ;;  %s721_s14 = sphi %s760_s14, %s19_s14   ;;  %s717_s13 = sphi %s758_s13, %s994_s13   ;;  %s713_s12 = sphi %s756_s12, %s993_s12   ;;  %s709_s11 = sphi %s754_s11, %s992_s11   ;;  %s705_s10 = sphi %s752_s10, %s991_s10   ;;  %s701_s9 = sphi %s750_s9, %s990_s9  }
   0x8   : > { %p60_p0 = scmp.ne.s32.totalorder %s705_s10, %s701_s9  ;;  %p784_p1 = scmp.eq.s32.totalorder %s470_s15, 0 }
   0x9   : > { %p788_p2 = scmp.eq.s32.totalorder %s470_s15, 1  ;;  %p120_p3 = scmp.eq.s32.totalorder %s471_s16, 1 }
   0xa   : > { %s974_s17 = scalar_select %p784_p1, 1, 0 }
   0xb   : > { %s975_s18 = scalar_select %p788_p2, 1, 0 }
   0xc   : > { %p794_p4 = por %p784_p1, %p60_p0  ;;  %p472_p5 = scmp.ge.s32.totalorder %s721_s14, 1 }
   0xd   : > { %p799_p6 = por %p120_p3, %p60_p0  ;;  %p127_p7 = scmp.lt.s32.totalorder %s721_s14, 3 }
   0xe   : > { %s976_s19 = scalar_select %p794_p4, 1, 0 }
   0xf   : > { %s977_s20 = scalar_select %p799_p6, 1, 0 }
  0x10   : > { %p804_p8 = pnand %p472_p5, %p127_p7  ;;  %s723_s22 = smov [#allocation5]  }
  0x11   : > { %s142_s23 = sshll.u32 %s723_s22, 4  ;;  %s38_s25 = sadd.s32 1, %s717_s13  ;;  %s143_s23 = int_to_ptr.vmem [resolvable:$true] %s142_s23 }
  0x12   : > { %s978_s21 = scalar_select %p804_p8, 1, 0 }
  0x13   : > { %p503_p10 = pneg %p804_p8  ;;  %s47_s26 = sadd.s32 1, %s709_s11 }
  0x14   : > { %p819_p12 = scmp.ge.s32.totalorder %s38_s25, 2  ;;  %s577_s30 = scalar_lea.hbm %s968_s1, 128 }
  0x15   : > { %p813_p11 = pnand %p503_p10, %p784_p1  ;;  %p578_p13 = scmp.ne.s32.totalorder %s968_s1, %s577_s30 }
  0x16   : > { %s980_s27 = scalar_select %p819_p12, 1, 0 }
  0x17   : > { %p579_p0 = pneg %p813_p11  ;;  %p584_p7 = scmp.lt.u32.totalorder %s577_s30, %s968_s1 }
  0x19   : > { %p580_p3 = pnand %p579_p0, %p578_p13 }
  0x1b   : > { %p581_p5 = pneg %p580_p3 }
  0x1d   : > { %p586_p10 = pnand %p584_p7, %p581_p5 }
  0x1f   : > { %589 = shalt.err (!%p586_p10)
}
  0x20   : > { %s590_s7 = scalar_lea.vmem %s143_s23, 128  ;;  %p598_p4 = scmp.lt.s32.totalorder %s143_s23, %s143_s23 }
  0x21   : > { %p591_p9 = scmp.ne.s32.totalorder %s143_s23, %s590_s7  ;;  %p599_p8 = scmp.lt.s32.totalorder %s590_s7, %s590_s7 }
  0x23   : > { %p593_p6 = pnand %p591_p9, %p579_p0  ;;  %p600_p2 = por %p599_p8, %p598_p4 }
  0x25   : > { %p594_p1 = pneg %p593_p6 }
  0x27   : > { %p601_p12 = pnand %p600_p2, %p594_p1 }
  0x29   : > { %604 = shalt.err (!%p601_p12)
}
  0x2a   : > { %506 = dma.hbm_to_vmem [thread:$0]  (!%p813_p11), %s968_s1, 128, %s143_s23, [#allocation6]  }
  0x2b   : > { %p981_p4 = scmp.ne.s32.totalorder %s980_s27, 0  ;;  %p54_p1 = scmp.ne.s32.totalorder %s709_s11, %s705_s10 }
  0x2c   : > { %p55_p2 = scmp.eq.s32.totalorder %s721_s14, 0  ;;  %p516_p6 = scmp.lt.s32.totalorder %s721_s14, 2 }
  0x2d   : > { %s996_s25 = smov (%p981_p4, %s38_s25), 0  ;;  %p982_p12 = scmp.ne.s32.totalorder %s975_s18, 0 }
  0x2e   : > { %s42_s16 = ssub.s32 %s717_s13, %s996_s25  ;;  %p56_p9 = por %p55_p2, %p54_p1 }
  0x2f   : > { %p45_p8 = scmp.eq.s32.totalorder %s42_s16, 0  ;;  %p851_p13 = por %p982_p12, %p54_p1 }
  0x30   : > { %s153_s24 = sand.u32 1, %s709_s11   ;;  %s487_s27 = sshll.u32 %s717_s13, 5 }
  0x31   : > { %s859_s28 = scalar_select %p45_p8, %s709_s11, %s47_s26  }
  0x32   : > { %s475_s23 = sshll.u32 %s153_s24, 1  ;;  %s865_s3 = scalar_lea.hbm %s967_s0, %s487_s27 }
  0x33   : > { %s157_s18 = scalar_lea.vmem [#allocation2], %s475_s23  ;;  %p869_p11 = pnand %p516_p6, %p56_p9 }
  0x34   : > { %s167_s4 = sshll.u32 %s157_s18, 4  ;;  %s154_s26 = scalar_lea.sflag [#allocation3], %s153_s24  ;;  %s867_s4 = int_to_ptr.vmem [resolvable:$true] %s167_s4 }
  0x35   : > { %s605_s6 = scalar_lea.hbm %s865_s3, 32  ;;  %p607_p3 = pneg %p869_p11 }
  0x36   : > { %p606_p0 = scmp.ne.s32.totalorder %s865_s3, %s605_s6  ;;  %s610_s15 = scalar_lea.hbm %s967_s0, 64 }
  0x37   : > { %p611_p10 = scmp.lt.u32.totalorder %s865_s3, %s967_s0  ;;  %p612_p4 = scmp.lt.u32.totalorder %s610_s15, %s605_s6 }
  0x38   : > { %p608_p5 = pnand %p607_p3, %p606_p0  ;;  %p614_p2 = scmp.lt.u32.totalorder %s605_s6, %s865_s3 }
  0x39   : > { %p613_p1 = por %p612_p4, %p611_p10 }
  0x3a   : > { %p609_p7 = pneg %p608_p5 }
  0x3b   : > { %p615_p6 = por %p614_p2, %p613_p1 }
  0x3d   : > { %p616_p8 = pnand %p615_p6, %p609_p7 }
  0x3f   : > { %619 = shalt.err (!%p616_p8)
}
  0x40   : > { %s620_s24 = scalar_lea.vmem %s867_s4, 32  ;;  %s724_s27 = smov [#allocation2]  }
  0x41   : > { %p621_p9 = scmp.ne.s32.totalorder %s867_s4, %s620_s24  ;;  %s625_s29 = sshll.u32 %s724_s27, 4  ;;  %s626_s29 = int_to_ptr.vmem [resolvable:$false] %s625_s29 }
  0x42   : > { %s627_s30 = scalar_lea.vmem %s626_s29, 64  ;;  %p628_p5 = scmp.lt.s32.totalorder %s867_s4, %s626_s29 }
  0x43   : > { %p623_p12 = pnand %p621_p9, %p607_p3  ;;  %p629_p10 = scmp.lt.s32.totalorder %s627_s30, %s620_s24 }
  0x45   : > { %p624_p0 = pneg %p623_p12  ;;  %p630_p4 = por %p629_p10, %p628_p5 }
  0x47   : > { %p631_p1 = pnand %p630_p4, %p624_p0 }
  0x49   : > { %634 = shalt.err (!%p631_p1)
}
  0x4a   : > { %510 = dma.hbm_to_vmem [thread:$0]  (!%p869_p11), %s865_s3, 32, %s867_s4, %s154_s26  }
  0x4b   : > { %p985_p7 = scmp.ne.s32.totalorder %s978_s21, 0 }
  0x4c   : > { %s901_s18 = sand.u32 (!%p985_p7), 1, %s705_s10   ;;  %p986_p3 = scmp.ne.s32.totalorder (!%p985_p7), %s976_s19, 0 }
  0x4d   : > { %176 = sbr.rel (%p985_p7) target bundleno = 464 (0x1d0), region = 28  ;;  %s479_s6 = sshll.u32 (!%p985_p7), %s901_s18, 1 }
  0x4e   : > { %s179_s7 = scalar_lea.sflag (!%p985_p7), [#allocation3], %s901_s18  ;;  %s182_s8 = scalar_lea.vmem (!%p985_p7), [#allocation2], %s479_s6 }
  0x54   : > { %688 = dma.done.wait (%p986_p3), %s179_s7, 32  }
  0x55   : > { %690 = vsyncadd (%p986_p3), %s179_s7, 4294967264  ;;  %p987_p2 = scmp.ne.s32.totalorder %s974_s17, 0 }
  0x57   : > { %692 = dma.done.wait (%p987_p2), [#allocation6], 128  }
  0x58   : > { %694 = vsyncadd (%p987_p2), [#allocation6], 4294967168  ;;  %v209_v0 = vlaneseq  ;;  %v207_v4 = vld [vmem:[%s182_s8] sm:$0x3]  ;;  %s725_s21 = smov 126   ;;  %s726_s3 = smov 127  }
  0x59   : > { %s727_s19 = smov 125   ;;  %s728_s4 = smov 124   ;;  %v729_v7 = vmov 0.0   ;;  %vm730_vm0 = vmmov 0   ;;  %vm221_vm1 = vcmask 1039360   ;;  %vm228_vm2 = vcmask 1031168  }
  0x5a   : > { %v210_v1 = vshrl.u32 %v209_v0, 7  ;;  %490 = vmatprep.subr.mxu0 %v729_v7  ;;  %492 = vmatprep.mubr.msk.f32.mxu0 %vm730_vm0, %v729_v7  ;;  %s731_s17 = smov 123   ;;  %s732_s5 = smov 122   ;;  %vm266_vm3 = vcmask 1040384   ;;  %vm235_vm4 = vcmask 1022976   ;;  %vm242_vm5 = vcmask 1014784  }
  0x5b   : > { %s733_s26 = smov 121   ;;  %vm268_vm6 = vcmask 1041408   ;;  %vm249_vm7 = vcmask 1006592   ;;  %vm270_vm8 = vcmask 1042432   ;;  %vm256_vm9 = vcmask 998400   ;;  %v280_v35 = vld [vmem:[#allocation5] sm:$0xff] }
  0x5c   : > { %v211_v2 = vsub.s32 0, %v210_v1  ;;  %v215_v3 = vsub.s32 1, %v210_v1  ;;  %vm272_vm10 = vcmask 1043456   ;;  %vm274_vm11 = vcmask 1044480   ;;  %s481_s15 = sshll.u32 %s901_s18, 3  ;;  %s484_s24 = sshll.u32 %s713_s12, 7 }
  0x5d   : > { %vm263_vm12 = vcmask 990208   ;;  %vm276_vm13 = vcmask 1045504   ;;  %vm278_vm14 = vcmask 1046528   ;;  %vm281_vm15 = vcmask 64512   ;;  %s206_s16 = scalar_lea.vmem [#allocation7], %s481_s15  ;;  %s920_s30 = scalar_lea.hbm %s969_s2, %s484_s24 }
  0x5e   : > { %v212_v5 = vrot.slane %v207_v4, %v211_v2  ;;  %v216_v6 = vrot.slane %v207_v4, %v215_v3  ;;  %s372_s23 = sshll.u32 %s206_s16, 4  ;;  %s357_s6 = scalar_lea.sflag [#allocation4], %s901_s18  ;;  %s915_s23 = int_to_ptr.vmem [resolvable:$true] %s372_s23 }
  0x5f   : > { %s635_s7 = scalar_lea.vmem %s915_s23, 128  ;;  %s734_s12 = smov [#allocation7]  }
  0x60   : > { %224 = vrot.lane.b32.xlu1 %v212_v5, %s725_s21  ;;  %217 = vrot.lane.b32.xlu0 %v212_v5, %s726_s3  ;;  %p636_p11 = scmp.ne.s32.totalorder %s915_s23, %s635_s7  ;;  %s639_s8 = sshll.u32 %s734_s12, 4  ;;  %s640_s8 = int_to_ptr.vmem [resolvable:$false] %s639_s8 }
  0x61   : > { %p642_p9 = scmp.lt.s32.totalorder %s915_s23, %s640_s8 }
  0x62   : > { %p637_p6 = pnand %p636_p11, %p851_p13 }
  0x64   : > { %226 = vrot.lane.b32.xlu1 %v216_v6, %s725_s21  ;;  %219 = vrot.lane.b32.xlu0 %v216_v6, %s726_s3  ;;  %p638_p8 = pneg %p637_p6  ;;  %s641_s21 = scalar_lea.vmem %s640_s8, 256 }
  0x65   : > { %p643_p12 = scmp.lt.s32.totalorder %s641_s21, %s635_s7 }
  0x67   : > { %p644_p0 = por %p643_p12, %p642_p9 }
  0x68   : > { %233 = vrot.lane.b32.xlu1 %v216_v6, %s727_s19  ;;  %231 = vrot.lane.b32.xlu0 %v212_v5, %s727_s19 }
  0x69   : > { %p645_p5 = pnand %p644_p0, %p638_p8 }
  0x6c   : > { %240 = vrot.lane.b32.xlu1 %v216_v6, %s728_s4  ;;  %238 = vrot.lane.b32.xlu0 %v212_v5, %s728_s4 }
  0x70   : > { %247 = vrot.lane.b32.xlu1 %v216_v6, %s731_s17  ;;  %245 = vrot.lane.b32.xlu0 %v212_v5, %s731_s17 }
  0x74   : > { %254 = vrot.lane.b32.xlu1 %v216_v6, %s732_s5  ;;  %252 = vrot.lane.b32.xlu0 %v212_v5, %s732_s5 }
  0x78   : > { %261 = vrot.lane.b32.xlu1 %v216_v6, %s733_s26  ;;  %259 = vrot.lane.b32.xlu0 %v212_v5, %s733_s26 }
  0xd2   : > { %v225_v8 = vpop.permute.xlu1 %224  ;;  %v218_v9 = vpop.permute.xlu0 %217 }
  0xd6   : > { %v227_v10 = vpop.permute.xlu1 %226  ;;  %v220_v11 = vpop.permute.xlu0 %219 }
  0xd7   : > { %v222_v16 = vsel %vm221_vm1, %v218_v9, %v220_v11  ;;  %v229_v19 = vsel %vm228_vm2, %v225_v8, %v227_v10 }
  0xd8   : > { %v267_v20 = vsel %vm266_vm3, %v207_v4, %v222_v16 }
  0xd9   : > { %v269_v25 = vsel %vm268_vm6, %v267_v20, %v229_v19 }
  0xda   : > { %v234_v12 = vpop.permute.xlu1 %233  ;;  %v232_v13 = vpop.permute.xlu0 %231 }
  0xdb   : > { %v236_v21 = vsel %vm235_vm4, %v232_v13, %v234_v12 }
  0xdc   : > { %v271_v27 = vsel %vm270_vm8, %v269_v25, %v236_v21 }
  0xde   : > { %v241_v14 = vpop.permute.xlu1 %240  ;;  %v239_v15 = vpop.permute.xlu0 %238 }
  0xdf   : > { %v243_v22 = vsel %vm242_vm5, %v239_v15, %v241_v14 }
  0xe0   : > { %v273_v29 = vsel %vm272_vm10, %v271_v27, %v243_v22 }
  0xe2   : > { %v248_v17 = vpop.permute.xlu1 %247  ;;  %v246_v18 = vpop.permute.xlu0 %245 }
  0xe3   : > { %v250_v26 = vsel %vm249_vm7, %v246_v18, %v248_v17 }
  0xe4   : > { %v275_v30 = vsel %vm274_vm11, %v273_v29, %v250_v26 }
  0xe6   : > { %v255_v23 = vpop.permute.xlu1 %254  ;;  %v253_v24 = vpop.permute.xlu0 %252 }
  0xe7   : > { %v257_v28 = vsel %vm256_vm9, %v253_v24, %v255_v23 }
  0xe8   : > { %v277_v34 = vsel %vm276_vm13, %v275_v30, %v257_v28 }
  0xea   : > { %v262_v31 = vpop.permute.xlu1 %261  ;;  %v260_v32 = vpop.permute.xlu0 %259 }
  0xeb   : > { %v264_v33 = vsel %vm263_vm12, %v260_v32, %v262_v31 }
  0xec   : > { %v279_v36 = vsel %vm278_vm14, %v277_v34, %v264_v33 }
  0xed   : > { %491 = vmatpush3.msra.mxu0 %v279_v36 }
  0xee   : > { %493 = vmatmul.mubr.msk.f32.vlgmr.msra.gmra.mrb[0].mxu0 %vm281_vm15, %v280_v35 }
 0x1c1   : > { %v351_v37 = vpop.f32.mrb[0].mxu0 }
 0x1c2   : > { %355 = vst [vmem:[%s206_s16] sm:$0xff] %v351_v37  ;;  %v494_v38 = vpop.f32.mrb[1].mxu0 }
 0x1c3   : > { %648 = shalt.err (!%p645_p5)
}
 0x1c4   : > { %s649_s18 = scalar_lea.hbm %s920_s30, 128  ;;  %s653_s4 = scalar_lea.hbm %s969_s2, 256 }
 0x1c5   : > { %p650_p10 = scmp.ne.s32.totalorder %s920_s30, %s649_s18  ;;  %p654_p7 = scmp.lt.u32.totalorder %s920_s30, %s969_s2 }
 0x1c6   : > { %p655_p3 = scmp.lt.u32.totalorder %s653_s4, %s649_s18  ;;  %p657_p11 = scmp.lt.u32.totalorder %s649_s18, %s920_s30 }
 0x1c7   : > { %p651_p4 = pnand %p650_p10, %p851_p13 }
 0x1c8   : > { %p656_p2 = por %p655_p3, %p654_p7 }
 0x1c9   : > { %p652_p1 = pneg %p651_p4 }
 0x1ca   : > { %p658_p6 = por %p657_p11, %p656_p2 }
 0x1cc   : > { %p659_p8 = pnand %p658_p6, %p652_p1 }
 0x1ce   : > { %662 = shalt.err (!%p659_p8)
}
 0x1cf   : > { %501 = dma.vmem_to_hbm [thread:$0]  (%p851_p13), %s915_s23, 128, %s920_s30, %s357_s6  }
 0x1d0 PF: > { %s384_s26 = sand.u32 1, %s701_s9   ;;  %p988_p9 = scmp.ne.s32.totalorder %s977_s20, 0 }
 0x1d1   : > { %p989_p12 = scmp.ge.s32.totalorder %s721_s14, 2  ;;  %s385_s15 = scalar_lea.sflag [#allocation4], %s384_s26 }
 0x1d3   : > { %p512_p0 = pnand %p989_p12, %p988_p9 }
 0x1d5   : > { %696 = dma.done.wait (!%p512_p0), %s385_s15, 128  }
 0x1d6   : > { %698 = vsyncadd (!%p512_p0), %s385_s15, 4294967168  ;;  %s19_s14 = sadd.s32 1, %s721_s14   ;;  %s990_s9 = smov %s705_s10 }
 0x1d7   : > { %p16_p5 = scmp.ge.s32.totalorder %s19_s14, 4   ;;  %s991_s10 = smov %s709_s11 }
 0x1d8   : > { %s992_s11 = smov %s859_s28  ;;  %s993_s12 = smov %s717_s13 }
 0x1d9   : > { %s994_s13 = smov %s996_s25  ;;  %18 = sbr.rel (!%p16_p5) target bundleno = 7 (0x7), region = 78 }
 0x1e0   :  { %390 = vsyncpa [#allocation3], 1 }
 0x1e1   :  { %392 = vsyncpa [#allocation3 + $0x1], 1 }
 0x1e2   :  { %393 = vsyncpa [#allocation6], 1 }
 0x1e3   :  { %394 = vsyncpa [#allocation4], 1 }
 0x1e4   :  { %396 = vsyncpa [#allocation4 + $0x1], 1 }

</bundles_post_ra>
